<compile_context>
chip_gen: v6e
topology: v6e:2x2x1
jax: 0.10.0
libtpu: 0.0.40
codegen_flags: <defaults>
</compile_context>

<pallas_src>
import functools

import jax
import jax.numpy as jnp
from jax.experimental import pallas as pl
from jax.experimental.pallas import tpu as pltpu


_LANE = 128
_ROW_MULT = 16               # sublane multiple that also covers bf16 packing
_MIN_ROWS_PER_STEP = 2048    # below this, per-grid-step overhead matters
_VMEM_TILE_BUDGET = 16 * 1024 * 1024   # target working set for one batch tile


def _round_up(x, m):
    return ((x + m - 1) // m) * m


def _pad_lanes(n):
    return _round_up(n, _LANE)


def _choose_fold(batch, o_dim):
    """Largest f with f*o_dim <= 128 and f | batch: fold f batch rows into the
    lane axis (block-diagonal weights) so EUP/VPU/ld/st work is lane-dense."""
    max_f = max(1, _LANE // max(1, o_dim))
    for f in range(max_f, 0, -1):
        if batch % f == 0:
            return f
    return 1


def _per_row_vmem_bytes(o_f, h_f, a_f, in_bytes):
    """Per-(folded)-row VMEM footprint of one tile, lane-padded."""
    obs_b = 2 * _pad_lanes(o_f) * in_bytes      # double-buffered obs tile
    out_b = 2 * _pad_lanes(a_f) * 4             # double-buffered f32 output tile
    h_b = _pad_lanes(h_f) * (4 + in_bytes)      # f32 hidden act + cast copy
    m_b = _pad_lanes(a_f) * 4                   # pre-tanh f32 output
    return obs_b + out_b + h_b + m_b


def _choose_block_rows(total_rows, per_row_bytes):
    cap = max(_ROW_MULT,
              (_VMEM_TILE_BUDGET // per_row_bytes) // _ROW_MULT * _ROW_MULT)
    if total_rows >= 2 * _MIN_ROWS_PER_STEP:
        # keep >= 2 grid steps so v7x's two TensorCores both get work
        two_step = _round_up(pl.cdiv(total_rows, 2), _ROW_MULT)
        return int(min(cap, two_step))
    if total_rows <= cap:
        return int(total_rows)          # single full-array block
    return int(cap)


def _dgp_mean_kernel(obs_ref, w1_ref, b1_ref, w2_ref, b2_ref, mean_ref):
    # obs_ref:  (TB, o_f)   bf16/f32      w1_ref: (o_f, h_f)   b1_ref: (1, h_f) f32
    # w2_ref:   (h_f, a_f)                b2_ref: (1, a_f) f32
    # mean_ref: (TB, a_f)   f32
    h = jnp.dot(obs_ref[...], w1_ref[...], preferred_element_type=jnp.float32)
    h = jnp.tanh(h + b1_ref[...])
    m = jnp.dot(h.astype(w2_ref.dtype), w2_ref[...],
                preferred_element_type=jnp.float32)
    m = jnp.tanh(m + b2_ref[...])
    mean_ref[...] = m.astype(mean_ref.dtype)


@functools.partial(jax.jit, static_argnames=("block_rows", "use_bf16"))
def dgp_forward(obs, w1, b1, w2, b2, log_std, *, block_rows=None, use_bf16=True):
    """Returns (mean, std) parameters of the Normal policy distribution.

    obs: [B, o_dim] f32; w1: [o_dim, 64] (transpose of torch Linear weight);
    b1: [64]; w2: [64, a_dim]; b2: [a_dim]; log_std: [a_dim].
    mean: [B, a_dim] f32; std: [a_dim] f32 (broadcasts like Normal(loc, scale)).

    use_bf16=True (default) casts obs/W1/W2 to bf16 with f32 MXU accumulation;
    mean error is ~1e-2 scale (tanh-bounded).  Use use_bf16=False for full f32.
    """
    B, o_dim = obs.shape
    hidden = w1.shape[1]
    a_dim = w2.shape[1]

    fold = _choose_fold(B, o_dim)
    rows = B // fold
    o_f, h_f, a_f = fold * o_dim, fold * hidden, fold * a_dim

    compute_dtype = jnp.bfloat16 if use_bf16 else jnp.float32
    in_bytes = 2 if use_bf16 else 4

    # Lane-pack: free row-major reshape; weights become small block-diagonals.
    obs_f = obs.reshape(rows, o_f).astype(compute_dtype)
    if fold > 1:
        eye = jnp.eye(fold, dtype=jnp.float32)
        w1_f = jnp.kron(eye, w1).astype(compute_dtype)
        w2_f = jnp.kron(eye, w2).astype(compute_dtype)
        b1_f = jnp.tile(b1, fold).reshape(1, h_f).astype(jnp.float32)
        b2_f = jnp.tile(b2, fold).reshape(1, a_f).astype(jnp.float32)
    else:
        w1_f = w1.astype(compute_dtype)
        w2_f = w2.astype(compute_dtype)
        b1_f = b1.reshape(1, h_f).astype(jnp.float32)
        b2_f = b2.reshape(1, a_f).astype(jnp.float32)

    per_row = _per_row_vmem_bytes(o_f, h_f, a_f, in_bytes)
    if block_rows is None:
        block_rows = _choose_block_rows(rows, per_row)
    block_rows = int(min(int(block_rows), rows))
    if block_rows < rows:
        block_rows = max(_ROW_MULT, (block_rows // _ROW_MULT) * _ROW_MULT)

    grid = (pl.cdiv(rows, block_rows),)

    weight_bytes = 2 * ((o_f * h_f + h_f * a_f) * in_bytes + (h_f + a_f) * 4)
    vmem_est = block_rows * per_row + weight_bytes
    vmem_limit = int(min(56 * 2**20, max(32 * 2**20, 2 * vmem_est)))

    mean_f = pl.pallas_call(
        _dgp_mean_kernel,
        out_shape=jax.ShapeDtypeStruct((rows, a_f), jnp.float32),
        grid=grid,
        in_specs=[
            pl.BlockSpec((block_rows, o_f), lambda i: (i, 0)),   # obs tile
            pl.BlockSpec((o_f, h_f), lambda i: (0, 0)),          # W1' (resident)
            pl.BlockSpec((1, h_f), lambda i: (0, 0)),            # b1'
            pl.BlockSpec((h_f, a_f), lambda i: (0, 0)),          # W2' (resident)
            pl.BlockSpec((1, a_f), lambda i: (0, 0)),            # b2'
        ],
        out_specs=pl.BlockSpec((block_rows, a_f), lambda i: (i, 0)),
        compiler_params=pltpu.CompilerParams(
            dimension_semantics=("parallel",),
            vmem_limit_bytes=vmem_limit),
    )(obs_f, w1_f, b1_f, w2_f, b2_f)

    mean = mean_f.reshape(B, a_dim)
    # std is obs-independent: computed once, no [B, a_dim] materialization.
    std = jnp.exp(log_std)
    return mean, std


def init_dgp_params(key, o_dim, a_dim, hidden=64):
    """Matches Mean_Module.__init__: xavier_uniform_ weights, zero biases,
    log_std = full(0.1).  Weights stored as [in, out] (torch Linear transposed)."""
    k1, k2 = jax.random.split(key)

    def xavier_uniform(k, fan_in, fan_out):
        limit = (6.0 / (fan_in + fan_out)) ** 0.5
        return jax.random.uniform(k, (fan_in, fan_out), jnp.float32,
                                  minval=-limit, maxval=limit)

    w1 = xavier_uniform(k1, o_dim, hidden)
    b1 = jnp.zeros((hidden,), jnp.float32)
    w2 = xavier_uniform(k2, hidden, a_dim)
    b2 = jnp.zeros((a_dim,), jnp.float32)
    log_std = jnp.full((a_dim,), 0.1, jnp.float32)
    return w1, b1, w2, b2, log_std


def dgp_reference(obs, w1, b1, w2, b2, log_std):
    h = jnp.tanh(obs @ w1 + b1)
    mean = jnp.tanh(h @ w2 + b2)
    std = jnp.exp(log_std)
    return mean, std


if __name__ == "__main__":
    B, O_DIM, A_DIM = 8, 32, 8

    key = jax.random.PRNGKey(0)
    k_obs, k_params = jax.random.split(key)

    obs = jax.random.normal(k_obs, (B, O_DIM), jnp.float32)
    w1, b1, w2, b2, log_std = init_dgp_params(k_params, O_DIM, A_DIM)
    mean_ref, std_ref = dgp_reference(obs, w1, b1, w2, b2, log_std)

    # 1) default bf16 path (lane-packed fold=4, single tile)
    mean, std = dgp_forward(obs, w1, b1, w2, b2, log_std)
    jax.block_until_ready((mean, std))
    assert mean.shape == (B, A_DIM) and std.shape == (A_DIM,)
    assert jnp.allclose(mean, mean_ref, atol=5e-2), "bf16 mean mismatch"
    assert jnp.allclose(std, std_ref, atol=1e-6), "std mismatch"

    # 2) f32 path, tight tolerance
    mean_f32, _ = dgp_forward(obs, w1, b1, w2, b2, log_std, use_bf16=False)
    jax.block_until_ready(mean_f32)
    assert jnp.allclose(mean_f32, mean_ref, atol=1e-4), "f32 mean mismatch"

    # 3) batches that don't fold by 4 (fold=2 and fold=1 paths), f32
    for B2 in (10, 7):
        obs2 = jax.random.normal(jax.random.PRNGKey(B2), (B2, O_DIM), jnp.float32)
        m2, _ = dgp_forward(obs2, w1, b1, w2, b2, log_std, use_bf16=False)
        jax.block_until_ready(m2)
        m2_ref, _ = dgp_reference(obs2, w1, b1, w2, b2, log_std)
        assert m2.shape == (B2, A_DIM)
        assert jnp.allclose(m2, m2_ref, atol=1e-4), f"B={B2} mean mismatch"

    # 4) multi-step grid with a ragged tail block (explicit small tile to
    #    exercise the pipelined / partial-tail path at small scale)
    B3 = 160   # fold=4 -> 40 folded rows, block_rows=16 -> grid=3, tail=8 rows
    obs3 = jax.random.normal(jax.random.PRNGKey(3), (B3, O_DIM), jnp.float32)
    m3, _ = dgp_forward(obs3, w1, b1, w2, b2, log_std, block_rows=16)
    jax.block_until_ready(m3)
    m3_ref, _ = dgp_reference(obs3, w1, b1, w2, b2, log_std)
    assert m3.shape == (B3, A_DIM)
    assert jnp.allclose(m3, m3_ref, atol=5e-2), "ragged multi-step mean mismatch"

    # TODO(synk): torch.distributions.Normal methods (sample / log_prob) have no
    # direct Pallas equivalent; the kernel returns the distribution's (loc, scale).
    print("KERNEL_OK")
</pallas_src>

<mosaic_0001>
module attributes {stable_mosaic.version = 11 : i64} {
  func.func @_dgp_mean_kernel(%arg0: i32, %arg1: memref<2x128xbf16, #tpu.memory_space<vmem>>, %arg2: memref<128x256xbf16, #tpu.memory_space<vmem>>, %arg3: memref<1x256xf32, #tpu.memory_space<vmem>>, %arg4: memref<256x32xbf16, #tpu.memory_space<vmem>>, %arg5: memref<1x32xf32, #tpu.memory_space<vmem>>, %arg6: memref<2x32xf32, #tpu.memory_space<vmem>>) attributes {dimension_semantics = [#tpu.dimension_semantics<parallel>], iteration_bounds = array<i64: 1>, scalar_prefetch = 0 : i64, scratch_operands = 0 : i64, tpu.core_type = #tpu.core_type<tc>, window_params = [{transform_indices = @transform_0, window_bounds = array<i64: 2, 128>}, {pipeline_mode = #tpu.pipeline_mode<synchronous>, transform_indices = @transform_1, window_bounds = array<i64: 128, 256>}, {pipeline_mode = #tpu.pipeline_mode<synchronous>, transform_indices = @transform_2, window_bounds = array<i64: 1, 256>}, {pipeline_mode = #tpu.pipeline_mode<synchronous>, transform_indices = @transform_3, window_bounds = array<i64: 256, 32>}, {pipeline_mode = #tpu.pipeline_mode<synchronous>, transform_indices = @transform_4, window_bounds = array<i64: 1, 32>}, {transform_indices = @transform_5, window_bounds = array<i64: 2, 32>}]} {
    %c0 = arith.constant 0 : index
    %c0_0 = arith.constant 0 : index
    %0 = vector.load %arg1[%c0, %c0_0] : memref<2x128xbf16, #tpu.memory_space<vmem>>, vector<2x128xbf16>
    %c0_1 = arith.constant 0 : index
    %c0_2 = arith.constant 0 : index
    %1 = vector.load %arg2[%c0_1, %c0_2] : memref<128x256xbf16, #tpu.memory_space<vmem>>, vector<128x256xbf16>
    %cst = arith.constant dense<0.000000e+00> : vector<2x256xf32>
    %2 = tpu.matmul %0, %1, %cst {dimension_numbers = #tpu.dot_dimension_numbers<[1], [0], [0], [1], [0, 0, 1, 1], [], []>} : vector<2x128xbf16>, vector<128x256xbf16>, vector<2x256xf32> -> vector<2x256xf32>
    %c0_3 = arith.constant 0 : index
    %c0_4 = arith.constant 0 : index
    %3 = vector.load %arg3[%c0_3, %c0_4] : memref<1x256xf32, #tpu.memory_space<vmem>>, vector<1x256xf32>
    %4 = vector.broadcast %3 : vector<1x256xf32> to vector<2x256xf32>
    %5 = arith.addf %2, %4 : vector<2x256xf32>
    %6 = math.tanh %5 : vector<2x256xf32>
    %7 = arith.truncf %6 : vector<2x256xf32> to vector<2x256xbf16>
    %c0_5 = arith.constant 0 : index
    %c0_6 = arith.constant 0 : index
    %8 = vector.load %arg4[%c0_5, %c0_6] : memref<256x32xbf16, #tpu.memory_space<vmem>>, vector<256x32xbf16>
    %cst_7 = arith.constant dense<0.000000e+00> : vector<2x32xf32>
    %9 = tpu.matmul %7, %8, %cst_7 {dimension_numbers = #tpu.dot_dimension_numbers<[1], [0], [0], [1], [0, 0, 1, 1], [], []>} : vector<2x256xbf16>, vector<256x32xbf16>, vector<2x32xf32> -> vector<2x32xf32>
    %c0_8 = arith.constant 0 : index
    %c0_9 = arith.constant 0 : index
    %10 = vector.load %arg5[%c0_8, %c0_9] : memref<1x32xf32, #tpu.memory_space<vmem>>, vector<1x32xf32>
    %11 = vector.broadcast %10 : vector<1x32xf32> to vector<2x32xf32>
    %12 = arith.addf %9, %11 : vector<2x32xf32>
    %13 = math.tanh %12 : vector<2x32xf32>
    %c0_10 = arith.constant 0 : index
    %c0_11 = arith.constant 0 : index
    %14 = vector.load %arg6[%c0_10, %c0_11] : memref<2x32xf32, #tpu.memory_space<vmem>>, vector<2x32xf32>
    tpu.vector_store %arg6[%c0_10, %c0_11], %13 {strides = array<i32>} : memref<2x32xf32, #tpu.memory_space<vmem>>, vector<2x32xf32>,
    return
  }
  func.func @transform_0(%arg0: i32) -> (i32, i32) {
    %c0_i32 = arith.constant 0 : i32
    %c0_i32_0 = arith.constant 0 : i32
    return %arg0, %c0_i32 : i32, i32
  }
  func.func @transform_1(%arg0: i32) -> (i32, i32) {
    %c0_i32 = arith.constant 0 : i32
    %c0_i32_0 = arith.constant 0 : i32
    %c0_i32_1 = arith.constant 0 : i32
    return %c0_i32, %c0_i32_0 : i32, i32
  }
  func.func @transform_2(%arg0: i32) -> (i32, i32) {
    %c0_i32 = arith.constant 0 : i32
    %c0_i32_0 = arith.constant 0 : i32
    %c0_i32_1 = arith.constant 0 : i32
    return %c0_i32, %c0_i32_0 : i32, i32
  }
  func.func @transform_3(%arg0: i32) -> (i32, i32) {
    %c0_i32 = arith.constant 0 : i32
    %c0_i32_0 = arith.constant 0 : i32
    %c0_i32_1 = arith.constant 0 : i32
    return %c0_i32, %c0_i32_0 : i32, i32
  }
  func.func @transform_4(%arg0: i32) -> (i32, i32) {
    %c0_i32 = arith.constant 0 : i32
    %c0_i32_0 = arith.constant 0 : i32
    %c0_i32_1 = arith.constant 0 : i32
    return %c0_i32, %c0_i32_0 : i32, i32
  }
  func.func @transform_5(%arg0: i32) -> (i32, i32) {
    %c0_i32 = arith.constant 0 : i32
    %c0_i32_0 = arith.constant 0 : i32
    return %arg0, %c0_i32 : i32, i32
  }
}

</mosaic_0001>

<bundles_post_ra>
// kernel: tile.13
= control target key start
LH: loop header
LB: loop body
LE: loop exit
PB: predicated region body
PF: predicated region fallthrough
CT: control target
= control target key end

     0   :  { %s22_s0 = inlined_call_operand.vmem [shape: f32[64], index: 0, kind: input, shape index: {}]   ;;  %s23_s1 = inlined_call_operand.vmem [shape: f32[4,64], index: 1, kind: output, shape index: {}]  }
   0x1   :  { %v4_v0 = vld [vmem:[%s22_s0] ss:$0 sm:$0xff] }
   0x2   :  { %5 = vst [vmem:[%s23_s1] sm:$0xf] %v4_v0 }

// kernel: tile.14
= control target key start
LH: loop header
LB: loop body
LE: loop exit
PB: predicated region body
PF: predicated region fallthrough
CT: control target
= control target key end

     0   :  { %s7_s8 = smov 3  ;;  %vm9_vm0 = vcmask 523264   ;;  %s34_s9 = smov 64   ;;  %vm16_vm1 = vcmask 1048064   ;;  %s54_s0 = inlined_call_operand.vmem [shape: f32[4,64], index: 0, kind: input, shape index: {}]   ;;  %s55_s1 = inlined_call_operand.vmem [shape: f32[1,256], index: 1, kind: output, shape index: {}]  }
   0x1   :  { %v5_v0 = vld [vmem:[%s54_s0] sm:$0xf]  ;;  %s12_s0 = smov 3 }
   0x2   :  { %6 = vst [vmem:[#allocation1] sm:$0xf] %v5_v0 }
   0x9   :  { %v13_v1 = vld [vmem:[#allocation1 + $0x1] ss:$2 sm:%s12_s0]   ;;  %v8_v2 = vld [vmem:[#allocation1] ss:$2 sm:%s7_s8]  }
   0xa   :  { %14 = vrot.lane.b32.xlu0 %v13_v1, %s34_s9  ;;  %10 = vst.msk [vmem:[#allocation0] ss:$8 sm:$0x3] %vm9_vm0, %v8_v2  }
  0x7c   :  { %v15_v3 = vpop.permute.xlu0 %14  }
  0x7d   :  { %17 = vst.msk [vmem:[#allocation0] ss:$8 sm:$0x3] %vm16_vm1, %v15_v3  }
  0x84   :  { %v22_v4 = vld [vmem:[#allocation0] sm:$0x1]  ;;  %v27_v5 = vld [vmem:[#allocation0 + $0x8] sm:$0x1] }
  0x85   :  { %25 = vst [vmem:[%s55_s1] sm:$0x1] %v22_v4  ;;  %32 = vst [vmem:[%s55_s1 + $0x1] sm:$0x1] %v27_v5 }

// kernel: tile.18
= control target key start
LH: loop header
LB: loop body
LE: loop exit
PB: predicated region body
PF: predicated region fallthrough
CT: control target
= control target key end

     0   :  { %s22_s0 = inlined_call_operand.vmem [shape: f32[8], index: 0, kind: input, shape index: {}]   ;;  %s23_s1 = inlined_call_operand.vmem [shape: f32[4,8], index: 1, kind: output, shape index: {}]  }
   0x1   :  { %v4_v0 = vld [vmem:[%s22_s0] ss:$0 sm:$0xff] }
   0x2   :  { %5 = vst [vmem:[%s23_s1] sm:$0xf] %v4_v0 }

// kernel: tile.19
= control target key start
LH: loop header
LB: loop body
LE: loop exit
PB: predicated region body
PF: predicated region fallthrough
CT: control target
= control target key end

     0   :  { %vm8_vm0 = vcmask 64512   ;;  %s40_s8 = smov 8   ;;  %s41_s9 = smov 16   ;;  %vm14_vm1 = vcmask 261312   ;;  %vm20_vm2 = vcmask 195712   ;;  %vm26_vm3 = vcmask 130112   ;;  %s58_s0 = inlined_call_operand.vmem [shape: f32[4,8], index: 0, kind: input, shape index: {}]   ;;  %s59_s1 = inlined_call_operand.vmem [shape: f32[1,32], index: 1, kind: output, shape index: {}]  }
   0x1   :  { %v5_v0 = vld [vmem:[%s58_s0] sm:$0xf]  ;;  %s39_s0 = smov 24  }
   0x2   :  { %6 = vst [vmem:[#allocation1] sm:$0xf] %v5_v0 }
   0x9   :  { %v11_v1 = vld [vmem:[#allocation1 + $0x3] sm:$0x1]   ;;  %v23_v2 = vld [vmem:[#allocation1 + $0x1] sm:$0x1]   ;;  %v7_v3 = vld [vmem:[#allocation1] sm:$0x1]  }
   0xa   :  { %12 = vrot.lane.b32.xlu0 %v11_v1, %s39_s0  ;;  %24 = vrot.lane.b32.xlu1 %v23_v2, %s40_s8  ;;  %v17_v4 = vld [vmem:[#allocation1 + $0x2] sm:$0x1]   ;;  %9 = vst.msk [vmem:[#allocation0] sm:$0x1] %vm8_vm0, %v7_v3  }
   0xe   :  { %18 = vrot.lane.b32.xlu0 %v17_v4, %s41_s9 }
  0x7c   :  { %v13_v5 = vpop.permute.xlu0 %12   ;;  %v25_v6 = vpop.permute.xlu1 %24  }
  0x7d   :  { %15 = vst.msk [vmem:[#allocation0] sm:$0x1] %vm14_vm1, %v13_v5  }
  0x80   :  { %v19_v7 = vpop.permute.xlu0 %18  }
  0x81   :  { %21 = vst.msk [vmem:[#allocation0] sm:$0x1] %vm20_vm2, %v19_v7  }
  0x82   :  { %27 = vst.msk [vmem:[#allocation0] sm:$0x1] %vm26_vm3, %v25_v6  }
  0x89   :  { %v32_v8 = vld [vmem:[#allocation0] sm:$0x1] }
  0x8a   :  { %35 = vst [vmem:[%s59_s1] sm:$0x1] %v32_v8 }

// kernel: dgp_forward.1
= control target key start
LH: loop header
LB: loop body
LE: loop exit
PB: predicated region body
PF: predicated region fallthrough
CT: control target
= control target key end

     0   :  { %v459_v1 = vmov 0   ;;  %v40_v34 = vlaneseq  ;;  %vm351_vm0 = vcmask 254976   ;;  %s598_s1 = inlined_call_operand.vmem [shape: bf16[128,256], index: 1, kind: input, shape index: {}]   ;;  %s599_s3 = inlined_call_operand.vmem [shape: bf16[256,32], index: 3, kind: input, shape index: {}]   ;;  %s600_s0 = inlined_call_operand.vmem [shape: bf16[2,128], index: 0, kind: input, shape index: {}]   ;;  %s601_s2 = inlined_call_operand.vmem [shape: f32[1,256], index: 2, kind: input, shape index: {}]   ;;  %s602_s4 = inlined_call_operand.vmem [shape: f32[1,32], index: 4, kind: input, shape index: {}]   ;;  %s603_s5 = inlined_call_operand.vmem [shape: f32[2,32], index: 5, kind: output, shape index: {}]  }
   0x1   :  { %v413_v0 = vld [vmem:[%s598_s1 + $0x74] ss:$8 sps:$4 sm:$0xff]   ;;  %162 = vmatprep.mubr.bf16.mxu0 %v459_v1  ;;  %v415_v2 = vld [vmem:[%s598_s1 + $0x70] ss:$8 sps:$4 sm:$0xff]   ;;  %v416_v3 = vld [vmem:[%s598_s1 + $0x64] ss:$8 sps:$4 sm:$0xff]  }
   0x2   :  { %130 = vmatprep.subr.bf16.mxu0 %v413_v0  ;;  %v418_v4 = vld [vmem:[%s598_s1 + $0x60] ss:$8 sps:$4 sm:$0xff]   ;;  %v419_v5 = vld [vmem:[%s598_s1 + $0x54] ss:$8 sps:$4 sm:$0xff]   ;;  %v421_v6 = vld [vmem:[%s598_s1 + $0x50] ss:$8 sps:$4 sm:$0xff]  }
   0x3   :  { %131 = vmatpush1.bf16.msra.mxu0 %v415_v2  ;;  %v422_v7 = vld [vmem:[%s598_s1 + $0x44] ss:$8 sps:$4 sm:$0xff]   ;;  %v424_v8 = vld [vmem:[%s598_s1 + $0x40] ss:$8 sps:$4 sm:$0xff]   ;;  %v425_v9 = vld [vmem:[%s598_s1 + $0x34] ss:$8 sps:$4 sm:$0xff]  }
   0x4   :  { %132 = vmatprep.subr.bf16.mxu0 %v416_v3  ;;  %v437_v10 = vld [vmem:[%s599_s3 + $0x78] sm:$0xff]   ;;  %v439_v13 = vld [vmem:[%s599_s3 + $0x70] sm:$0xff]   ;;  %v441_v15 = vld [vmem:[%s599_s3 + $0x68] sm:$0xff]   ;;  %v41_v35 = vshrl.u32 %v40_v34, 7 }
   0x5   :  { %v438_v11 = vld [vmem:[%s599_s3 + $0x38] sm:$0xff]   ;;  %390 = vmatprep.subr.bf16.mxu1 %v437_v10  ;;  %v440_v14 = vld [vmem:[%s599_s3 + $0x30] sm:$0xff]   ;;  %v428_v16 = vld [vmem:[%s598_s1 + $0x24] ss:$8 sps:$4 sm:$0xff]  }
   0x6   :  { %v427_v12 = vld [vmem:[%s598_s1 + $0x30] ss:$8 sps:$4 sm:$0xff]   ;;  %391 = vmatpush3.bf16.msra.mxu1 %v438_v11  ;;  %v430_v17 = vld [vmem:[%s598_s1 + $0x20] ss:$8 sps:$4 sm:$0xff]   ;;  %v431_v19 = vld [vmem:[%s598_s1 + $0x14] ss:$8 sps:$4 sm:$0xff]  }
   0x7   :  { %133 = vmatpush1.bf16.msra.mxu0 %v418_v4  ;;  %392 = vmatprep.subr.bf16.mxu1 %v439_v13  ;;  %v442_v18 = vld [vmem:[%s599_s3 + $0x28] sm:$0xff]   ;;  %v433_v20 = vld [vmem:[%s598_s1 + $0x10] ss:$8 sps:$4 sm:$0xff]   ;;  %v21_v23 = vld [vmem:[%s600_s0] sm:$0x1]  ;;  %v42_v36 = vsub.s32 0, %v41_v35 }
   0x8   :  { %134 = vmatprep.subr.bf16.mxu0 %v419_v5  ;;  %v434_v21 = vld [vmem:[%s598_s1 + $0x4] ss:$8 sps:$4 sm:$0xff]   ;;  %v436_v22 = vld [vmem:[%s598_s1] ss:$8 sps:$4 sm:$0xff]   ;;  %v445_v26 = vld [vmem:[%s599_s3 + $0x58] sm:$0xff]   ;;  %v46_v38 = vsub.s32 1, %v41_v35 }
   0x9   :  { %v443_v24 = vld [vmem:[%s599_s3 + $0x60] sm:$0xff]   ;;  %v446_v27 = vld [vmem:[%s599_s3 + $0x18] sm:$0xff]   ;;  %v447_v28 = vld [vmem:[%s599_s3 + $0x50] sm:$0xff]  }
   0xa   :  { %393 = vmatpush3.bf16.msra.mxu1 %v440_v14  ;;  %v444_v25 = vld [vmem:[%s599_s3 + $0x20] sm:$0xff]   ;;  %v448_v29 = vld [vmem:[%s599_s3 + $0x10] sm:$0xff]   ;;  %v449_v30 = vld [vmem:[%s599_s3 + $0x48] sm:$0xff]  }
   0xb   :  { %135 = vmatpush1.bf16.msra.mxu0 %v421_v6  ;;  %394 = vmatprep.subr.bf16.mxu1 %v441_v15  ;;  %v450_v31 = vld [vmem:[%s599_s3 + $0x8] sm:$0xff]   ;;  %v451_v32 = vld [vmem:[%s599_s3 + $0x40] sm:$0xff]  }
   0xc   :  { %136 = vmatprep.subr.bf16.mxu0 %v422_v7  ;;  %v452_v33 = vld [vmem:[%s599_s3] sm:$0xff]  }
   0xd   :  { %v38_v37 = vld [vmem:[%s601_s2] sm:$0x3] }
   0xe   :  { %395 = vmatpush3.bf16.msra.mxu1 %v442_v18  ;;  %v43_v39 = vrot.slane %v38_v37, %v42_v36  ;;  %v47_v40 = vrot.slane %v38_v37, %v46_v38  ;;  %v373_v52 = vld [vmem:[%s602_s4] ss:$0 sm:$0xff] }
   0xf   :  { %137 = vmatpush1.bf16.msra.mxu0 %v424_v8  ;;  %396 = vmatprep.subr.bf16.mxu1 %v443_v24 }
  0x10   :  { %138 = vmatprep.subr.bf16.mxu0 %v425_v9 }
  0x12   :  { %397 = vmatpush3.bf16.msra.mxu1 %v444_v25 }
  0x13   :  { %139 = vmatpush1.bf16.msra.mxu0 %v427_v12  ;;  %398 = vmatprep.subr.bf16.mxu1 %v445_v26 }
  0x14   :  { %140 = vmatprep.subr.bf16.mxu0 %v428_v16 }
  0x16   :  { %399 = vmatpush3.bf16.msra.mxu1 %v446_v27 }
  0x17   :  { %141 = vmatpush1.bf16.msra.mxu0 %v430_v17  ;;  %400 = vmatprep.subr.bf16.mxu1 %v447_v28 }
  0x18   :  { %142 = vmatprep.subr.bf16.mxu0 %v431_v19 }
  0x1a   :  { %401 = vmatpush3.bf16.msra.mxu1 %v448_v29 }
  0x1b   :  { %143 = vmatpush1.bf16.msra.mxu0 %v433_v20  ;;  %402 = vmatprep.subr.bf16.mxu1 %v449_v30 }
  0x1c   :  { %144 = vmatprep.subr.bf16.mxu0 %v434_v21 }
  0x1e   :  { %403 = vmatpush3.bf16.msra.mxu1 %v450_v31 }
  0x1f   :  { %145 = vmatpush1.bf16.msra.mxu0 %v436_v22  ;;  %404 = vmatprep.subr.bf16.mxu1 %v451_v32 }
  0x22   :  { %163 = vmatmul.mubr.bf16.vlgmr.msra.gmra.mxu0 %v21_v23  ;;  %405 = vmatpush3.bf16.msra.mxu1 %v452_v33 }
  0xe2   :  { %v164_v41 = vpop.f32.mrf.mxu0 }
  0xe3   :  { %v165_v42 = vadd.f32 %v164_v41, %v43_v39 }
  0xe4   :  { %v166_v43 = vpop.f32.mrf.mxu0 }
  0xe5   :  { %v167_v44 = vadd.f32 %v166_v43, %v47_v40  ;;  %453 = vtanh.f32 %v165_v42 }
  0xe6   :  { %v168_v45 = vpop.f32.mrf.mxu0 }
  0xe7   :  { %455 = vtanh.f32 %v167_v44 }
  0xe8   :  { %v169_v46 = vpop.f32.mrf.mxu0 }
  0xf2   :  { %v454_v47 = vpop.eup %453 }
  0xf3   :  { %v173_v50 = vpack.c.bf16 %v454_v47, %v454_v47 }
  0xf4   :  { %v456_v48 = vpop.eup %455 }
  0xf5   :  { %v174_v49 = vpack.c.bf16 %v456_v48, %v456_v48 }
  0xf7   :  { %342 = vmatprep.mubr.bf16.mxu1 %v174_v49 }
  0xf8   :  { %343 = vmatmul.mubr.bf16.vlgmr.msra.gmra.mxu1 %v173_v50 }
 0x1b8   :  { %v406_v51 = vpop.f32.mrf.mxu1 }
 0x1ba   :  { %v407_v53 = vpop.f32.mrf.mxu1 }
 0x1bb   :  { %v408_v54 = vadd.f32 %v407_v53, %v406_v51 }
 0x1bc   :  { %v409_v55 = vpop.f32.mrf.mxu1 }
 0x1bd   :  { %v345_v56 = vadd.f32 %v408_v54, %v373_v52 }
 0x1be   :  { %v410_v57 = vpop.f32.mrf.mxu1 }
 0x1bf   :  { %457 = vtanh.f32 %v345_v56 }
 0x1cc   :  { %v458_v58 = vpop.eup %457 }
 0x1cd   :  { %352 = vst.msk [vmem:[%s603_s5] sm:$0x3] %vm351_vm0, %v458_v58 }

</bundles_post_ra>
